<compile_context>
chip_gen: v6e
topology: v6e:2x2x1
jax: 0.10.0
libtpu: 0.0.40
codegen_flags: <defaults>
</compile_context>

<pallas_src>
import math

import jax
import jax.numpy as jnp
from jax.experimental import pallas as pl
from jax.experimental.pallas import tpu as pltpu


_GELU_C = math.sqrt(2.0 / math.pi)


def _gelu_new(x):
    # GPT-2 "gelu_new": 0.5*x*(1+tanh(sqrt(2/pi)*(x + 0.044715*x**3)))
    return 0.5 * x * (1.0 + jnp.tanh(_GELU_C * (x + 0.044715 * x * x * x)))


def _round_up(x, m):
    return (x + m - 1) // m * m


# ----------------------------- kernels ------------------------------------


def _mlp_stream_acc_kernel(x_ref, wfc_ref, bfc_ref, wproj_ref, bproj_ref,
                           o_ref, acc_ref):
    """Streamed weight slabs, f32 scratch accumulator (non-f32 outputs)."""
    k = pl.program_id(1)

    @pl.when(k == 0)
    def _():
        acc_ref[...] = jnp.zeros_like(acc_ref)

    h = jnp.dot(x_ref[...], wfc_ref[...], preferred_element_type=jnp.float32)
    h = _gelu_new(h + bfc_ref[...])
    acc_ref[...] += jnp.dot(h.astype(wproj_ref.dtype), wproj_ref[...],
                            preferred_element_type=jnp.float32)

    @pl.when(k == pl.num_programs(1) - 1)
    def _():
        o_ref[...] = (acc_ref[...] + bproj_ref[...]).astype(o_ref.dtype)
        # dropout: inference-mode identity (no-op)


def _mlp_stream_f32out_kernel(x_ref, wfc_ref, bfc_ref, wproj_ref, bproj_ref,
                              o_ref):
    """Streamed weight slabs; accumulate directly into the resident f32 out."""
    k = pl.program_id(1)

    @pl.when(k == 0)
    def _():
        o_ref[...] = jnp.zeros_like(o_ref)

    h = jnp.dot(x_ref[...], wfc_ref[...], preferred_element_type=jnp.float32)
    h = _gelu_new(h + bfc_ref[...])
    o_ref[...] += jnp.dot(h.astype(wproj_ref.dtype), wproj_ref[...],
                          preferred_element_type=jnp.float32)

    @pl.when(k == pl.num_programs(1) - 1)
    def _():
        o_ref[...] += bproj_ref[...]
        # dropout: inference-mode identity (no-op)


def _mlp_resident_kernel(x_ref, wfc_ref, bfc_ref, wproj_ref, bproj_ref, o_ref):
    """Whole weight matrices resident in VMEM; 1-D grid over row tiles."""
    h = jnp.dot(x_ref[...], wfc_ref[...], preferred_element_type=jnp.float32)
    h = _gelu_new(h + bfc_ref[...])
    out = jnp.dot(h.astype(wproj_ref.dtype), wproj_ref[...],
                  preferred_element_type=jnp.float32)
    o_ref[...] = (out + bproj_ref[...]).astype(o_ref.dtype)
    # dropout: inference-mode identity (no-op)


# --------------------------- tiling helpers --------------------------------


def _vmem_limit_and_budget():
    """(vmem_limit_bytes for the compiler, planning budget for our tiles)."""
    try:
        info = pltpu.get_tpu_info()
        cap = int(getattr(info, "vmem_capacity_bytes", 0)) or (64 << 20)
    except Exception:
        cap = 64 << 20  # conservative: v7x per-core physical VMEM
    vmem_limit = max(cap - (8 << 20), 32 << 20)  # headroom below physical
    budget = max(vmem_limit - (4 << 20), 24 << 20)
    return vmem_limit, budget


def _pick_tile_i(I_pad, H, budget, max_tile_i=1536):
    """Largest multiple-of-128 divisor of I_pad whose slabs fit ~1/3 budget."""
    if I_pad % 128 != 0:
        return I_pad
    cands = [d for d in range(128, min(I_pad, max_tile_i) + 1, 128)
             if I_pad % d == 0]
    if not cands:
        return I_pad
    for d in sorted(cands, reverse=True):
        # double-buffered bf16 (H,ti) + (ti,H) slabs = 8*H*ti bytes
        if 8 * H * d <= budget // 3:
            return d
    return cands[0]


def _pick_tile_m(M, H, tile_i, budget, out_itemsize, use_acc, target=1024):
    slab_bytes = 8 * H * tile_i                 # double-buffered weight slabs
    per_row = (4 * H                            # x tile, double-buffered bf16
               + 2 * out_itemsize * H           # out tile, double-buffered
               + (4 * H if use_acc else 0)      # f32 scratch accumulator
               + 6 * tile_i)                    # f32 gelu temp + bf16 cast
    avail = budget - slab_bytes - (2 << 20)
    tm = max(16, min(target, avail // max(per_row, 1)))
    tm = max(16, (tm // 16) * 16)
    return int(min(tm, _round_up(M, 16)))


def _resident_plan(M, H, I_pad, budget, out_itemsize, target=1024):
    """Row tile for the weights-resident path, or None if weights don't fit."""
    w_bytes = 2 * (2 * H * I_pad * 2)           # both weights, 2x buffers, bf16
    per_row = 4 * H + 2 * out_itemsize * H + 6 * I_pad
    avail = budget - w_bytes - (2 << 20)
    if avail <= 0:
        return None
    tm = (min(target, avail // max(per_row, 1)) // 16) * 16
    if tm < 16:
        return None
    return int(min(tm, _round_up(M, 16)))


# ------------------------------ wrapper -------------------------------------


def gpt2_mlp(hidden_states, w_fc, b_fc, w_proj, b_proj, *,
             compute_dtype=jnp.bfloat16, tile_m=None, tile_i=None,
             weights_resident=None):
    """GPT2MLP forward. hidden_states: [..., H]. Returns same shape/dtype."""
    orig_shape = hidden_states.shape
    out_dtype = hidden_states.dtype
    H = orig_shape[-1]
    I = w_fc.shape[-1]
    assert w_fc.shape == (H, I) and w_proj.shape == (I, H)
    assert b_fc.shape[-1] == I and b_proj.shape[-1] == H

    x2d = hidden_states.reshape(-1, H)
    M = x2d.shape[0]
    out_itemsize = jnp.dtype(out_dtype).itemsize
    vmem_limit, budget = _vmem_limit_and_budget()

    # --- pad intermediate dim to a lane multiple (exact: gelu_new(0) = 0) ---
    I_pad = _round_up(I, 128)
    b_fc = b_fc.reshape(-1)
    b_proj = b_proj.reshape(-1)
    if I_pad != I:
        w_fc = jnp.pad(w_fc, ((0, 0), (0, I_pad - I)))
        b_fc = jnp.pad(b_fc, ((0, I_pad - I),))
        w_proj = jnp.pad(w_proj, ((0, I_pad - I), (0, 0)))

    # --- dtypes: bf16 MXU inputs, f32 biases (accumulation is f32) ---
    wfc_c = w_fc.astype(compute_dtype)
    wproj_c = w_proj.astype(compute_dtype)
    bfc_c = b_fc.reshape(1, I_pad).astype(jnp.float32)
    bproj_c = b_proj.reshape(1, H).astype(jnp.float32)

    # --- path selection ---
    resident_tm = _resident_plan(M, H, I_pad, budget, out_itemsize)
    if weights_resident is None:
        weights_resident = resident_tm is not None
    if weights_resident and resident_tm is None:
        weights_resident = False        # requested but won't fit -> stream

    use_acc = jnp.dtype(out_dtype) != jnp.dtype(jnp.float32)

    if weights_resident:
        if tile_m is not None:
            tm = min(max(16, _round_up(int(tile_m), 16)), _round_up(M, 16))
        else:
            tm = resident_tm
        ti = I_pad
    else:
        if tile_i is not None:
            ti = int(tile_i)
            if I_pad % ti != 0 or (ti % 128 != 0 and ti != I_pad):
                ti = _pick_tile_i(I_pad, H, budget)
        else:
            ti = _pick_tile_i(I_pad, H, budget)
        if tile_m is not None:
            tm = min(max(16, _round_up(int(tile_m), 16)), _round_up(M, 16))
        else:
            tm = _pick_tile_m(M, H, ti, budget, out_itemsize, use_acc)

    # --- row padding; keep >=2 row tiles when there's enough work so the
    #     parallel axis shards across both TensorCores on v7x ---
    tm = max(16, tm)
    M_pad = _round_up(M, tm)
    if M_pad // tm < 2 and M > 256:
        tm = _round_up((M + 1) // 2, 16)
        M_pad = 2 * tm
    if M_pad != M:
        x2d = jnp.pad(x2d, ((0, M_pad - M), (0, 0)))
    xc = x2d.astype(compute_dtype)
    grid_m = M_pad // tm

    # --- grid / specs per path ---
    if weights_resident:
        grid = (grid_m,)
        in_specs = [
            pl.BlockSpec((tm, H), lambda i: (i, 0)),        # x row tile
            pl.BlockSpec((H, I_pad), lambda i: (0, 0)),     # W_fc (resident)
            pl.BlockSpec((1, I_pad), lambda i: (0, 0)),     # b_fc
            pl.BlockSpec((I_pad, H), lambda i: (0, 0)),     # W_proj (resident)
            pl.BlockSpec((1, H), lambda i: (0, 0)),         # b_proj
        ]
        out_specs = pl.BlockSpec((tm, H), lambda i: (i, 0))
        kernel = _mlp_resident_kernel
        scratch = []
        dims = ("parallel",)
        weight_stream_factor = 1
    else:
        grid = (grid_m, I_pad // ti)
        in_specs = [
            pl.BlockSpec((tm, H), lambda i, k: (i, 0)),     # x (resident over k)
            pl.BlockSpec((H, ti), lambda i, k: (0, k)),     # W_fc slab
            pl.BlockSpec((1, ti), lambda i, k: (0, k)),     # b_fc slab
            pl.BlockSpec((ti, H), lambda i, k: (k, 0)),     # W_proj slab
            pl.BlockSpec((1, H), lambda i, k: (0, 0)),      # b_proj
        ]
        out_specs = pl.BlockSpec((tm, H), lambda i, k: (i, 0))
        if use_acc:
            kernel = _mlp_stream_acc_kernel
            scratch = [pltpu.VMEM((tm, H), jnp.float32)]
        else:
            kernel = _mlp_stream_f32out_kernel
            scratch = []
        dims = ("parallel", "arbitrary")
        weight_stream_factor = grid_m

    w_itemsize = jnp.dtype(compute_dtype).itemsize
    cost = pl.CostEstimate(
        flops=4 * M_pad * H * I_pad,
        transcendentals=M_pad * I_pad,
        bytes_accessed=int(M_pad * H * w_itemsize
                           + weight_stream_factor * 2 * H * I_pad * w_itemsize
                           + (I_pad + H) * 4
                           + M_pad * H * out_itemsize),
    )

    out = pl.pallas_call(
        kernel,
        out_shape=jax.ShapeDtypeStruct((M_pad, H), out_dtype),
        grid_spec=pltpu.PrefetchScalarGridSpec(
            num_scalar_prefetch=0,
            grid=grid,
            in_specs=in_specs,
            out_specs=out_specs,
            scratch_shapes=scratch,
        ),
        compiler_params=pltpu.CompilerParams(
            dimension_semantics=dims,
            vmem_limit_bytes=int(vmem_limit)),
        cost_estimate=cost,
    )(xc, wfc_c, bfc_c, wproj_c, bproj_c)

    if M_pad != M:
        out = out[:M]
    return out.reshape(orig_shape)


def init_params(key, hidden_size, intermediate_size, dtype=jnp.float32):
    k1, k2 = jax.random.split(key)
    # Conv1D: weight ~ N(0, 0.02), shape (nx, nf); bias zeros(nf)
    w_fc = 0.02 * jax.random.normal(k1, (hidden_size, intermediate_size), dtype)
    b_fc = jnp.zeros((intermediate_size,), dtype)
    w_proj = 0.02 * jax.random.normal(k2, (intermediate_size, hidden_size), dtype)
    b_proj = jnp.zeros((hidden_size,), dtype)
    return w_fc, b_fc, w_proj, b_proj


def _ref_mlp(x, w_fc, b_fc, w_proj, b_proj):
    h = x.reshape(-1, x.shape[-1]).astype(jnp.float32)
    out = _gelu_new(h @ w_fc + b_fc) @ w_proj + b_proj
    return out.reshape(x.shape)


if __name__ == "__main__":
    key = jax.random.PRNGKey(0)

    # --- test 1: small GPT-2-style shape, auto path (weights resident) ---
    batch, seq, hidden = 2, 8, 32
    intermediate = 4 * hidden  # 128
    kx, kp = jax.random.split(key)
    x = jax.random.normal(kx, (batch, seq, hidden), jnp.float32)
    w_fc, b_fc, w_proj, b_proj = init_params(kp, hidden, intermediate)
    ref = _ref_mlp(x, w_fc, b_fc, w_proj, b_proj)

    y = jax.block_until_ready(gpt2_mlp(x, w_fc, b_fc, w_proj, b_proj))
    assert jnp.allclose(y, ref, atol=2e-2, rtol=2e-2), "resident path mismatch"

    # --- test 2: streamed-slab path, f32 output (accumulate into o_ref) ---
    y2 = jax.block_until_ready(
        gpt2_mlp(x, w_fc, b_fc, w_proj, b_proj, weights_resident=False))
    assert jnp.allclose(y2, ref, atol=2e-2, rtol=2e-2), "streamed f32 mismatch"

    # --- test 3: streamed path with multi-step I reduction, padded M and
    #     padded I (320 -> 384), bf16 output (scratch-accumulator kernel) ---
    h2, i2, b2, s2 = 128, 320, 2, 7
    kx2, kp2 = jax.random.split(jax.random.PRNGKey(1))
    x2 = jax.random.normal(kx2, (b2, s2, h2), jnp.float32)
    w_fc2, b_fc2, w_proj2, b_proj2 = init_params(kp2, h2, i2)
    ref2 = _ref_mlp(x2, w_fc2, b_fc2, w_proj2, b_proj2)

    y3 = gpt2_mlp(x2.astype(jnp.bfloat16), w_fc2, b_fc2, w_proj2, b_proj2,
                  weights_resident=False, tile_i=128)
    y3 = jax.block_until_ready(y3)
    assert jnp.allclose(y3.astype(jnp.float32), ref2, atol=5e-2, rtol=5e-2), \
        "streamed bf16 multi-k mismatch"

    print("KERNEL_OK")
</pallas_src>

<mosaic_0001>
module attributes {stable_mosaic.version = 11 : i64} {
  func.func @_mlp_resident_kernel(%arg0: i32, %arg1: memref<16x32xbf16, #tpu.memory_space<vmem>>, %arg2: memref<32x128xbf16, #tpu.memory_space<vmem>>, %arg3: memref<1x128xf32, #tpu.memory_space<vmem>>, %arg4: memref<128x32xbf16, #tpu.memory_space<vmem>>, %arg5: memref<1x32xf32, #tpu.memory_space<vmem>>, %arg6: memref<16x32xf32, #tpu.memory_space<vmem>>) attributes {dimension_semantics = [#tpu.dimension_semantics<parallel>], iteration_bounds = array<i64: 1>, scalar_prefetch = 0 : i64, scratch_operands = 0 : i64, tpu.core_type = #tpu.core_type<tc>, window_params = [{transform_indices = @transform_0, window_bounds = array<i64: 16, 32>}, {pipeline_mode = #tpu.pipeline_mode<synchronous>, transform_indices = @transform_1, window_bounds = array<i64: 32, 128>}, {pipeline_mode = #tpu.pipeline_mode<synchronous>, transform_indices = @transform_2, window_bounds = array<i64: 1, 128>}, {pipeline_mode = #tpu.pipeline_mode<synchronous>, transform_indices = @transform_3, window_bounds = array<i64: 128, 32>}, {pipeline_mode = #tpu.pipeline_mode<synchronous>, transform_indices = @transform_4, window_bounds = array<i64: 1, 32>}, {transform_indices = @transform_5, window_bounds = array<i64: 16, 32>}]} {
    %c0 = arith.constant 0 : index
    %c0_0 = arith.constant 0 : index
    %0 = vector.load %arg1[%c0, %c0_0] : memref<16x32xbf16, #tpu.memory_space<vmem>>, vector<16x32xbf16>
    %c0_1 = arith.constant 0 : index
    %c0_2 = arith.constant 0 : index
    %1 = vector.load %arg2[%c0_1, %c0_2] : memref<32x128xbf16, #tpu.memory_space<vmem>>, vector<32x128xbf16>
    %cst = arith.constant dense<0.000000e+00> : vector<16x128xf32>
    %2 = tpu.matmul %0, %1, %cst {dimension_numbers = #tpu.dot_dimension_numbers<[1], [0], [0], [1], [0, 0, 1, 1], [], []>} : vector<16x32xbf16>, vector<32x128xbf16>, vector<16x128xf32> -> vector<16x128xf32>
    %c0_3 = arith.constant 0 : index
    %c0_4 = arith.constant 0 : index
    %3 = vector.load %arg3[%c0_3, %c0_4] : memref<1x128xf32, #tpu.memory_space<vmem>>, vector<1x128xf32>
    %4 = vector.broadcast %3 : vector<1x128xf32> to vector<16x128xf32>
    %5 = arith.addf %2, %4 : vector<16x128xf32>
    %cst_5 = arith.constant 5.000000e-01 : f32
    %6 = vector.broadcast %cst_5 : f32 to vector<16x128xf32>
    %7 = arith.mulf %6, %5 : vector<16x128xf32>
    %cst_6 = arith.constant 4.471500e-02 : f32
    %8 = vector.broadcast %cst_6 : f32 to vector<16x128xf32>
    %9 = arith.mulf %8, %5 : vector<16x128xf32>
    %10 = arith.mulf %9, %5 : vector<16x128xf32>
    %11 = arith.mulf %10, %5 : vector<16x128xf32>
    %12 = arith.addf %5, %11 : vector<16x128xf32>
    %cst_7 = arith.constant 0.797884583 : f32
    %13 = vector.broadcast %cst_7 : f32 to vector<16x128xf32>
    %14 = arith.mulf %13, %12 : vector<16x128xf32>
    %15 = math.tanh %14 : vector<16x128xf32>
    %cst_8 = arith.constant 1.000000e+00 : f32
    %16 = vector.broadcast %cst_8 : f32 to vector<16x128xf32>
    %17 = arith.addf %16, %15 : vector<16x128xf32>
    %18 = arith.mulf %7, %17 : vector<16x128xf32>
    %19 = arith.truncf %18 : vector<16x128xf32> to vector<16x128xbf16>
    %c0_9 = arith.constant 0 : index
    %c0_10 = arith.constant 0 : index
    %20 = vector.load %arg4[%c0_9, %c0_10] : memref<128x32xbf16, #tpu.memory_space<vmem>>, vector<128x32xbf16>
    %cst_11 = arith.constant dense<0.000000e+00> : vector<16x32xf32>
    %21 = tpu.matmul %19, %20, %cst_11 {dimension_numbers = #tpu.dot_dimension_numbers<[1], [0], [0], [1], [0, 0, 1, 1], [], []>} : vector<16x128xbf16>, vector<128x32xbf16>, vector<16x32xf32> -> vector<16x32xf32>
    %c0_12 = arith.constant 0 : index
    %c0_13 = arith.constant 0 : index
    %22 = vector.load %arg5[%c0_12, %c0_13] : memref<1x32xf32, #tpu.memory_space<vmem>>, vector<1x32xf32>
    %23 = vector.broadcast %22 : vector<1x32xf32> to vector<16x32xf32>
    %24 = arith.addf %21, %23 : vector<16x32xf32>
    %c0_14 = arith.constant 0 : index
    %c0_15 = arith.constant 0 : index
    %25 = vector.load %arg6[%c0_14, %c0_15] : memref<16x32xf32, #tpu.memory_space<vmem>>, vector<16x32xf32>
    tpu.vector_store %arg6[%c0_14, %c0_15], %24 {strides = array<i32>} : memref<16x32xf32, #tpu.memory_space<vmem>>, vector<16x32xf32>,
    return
  }
  func.func @transform_0(%arg0: i32) -> (i32, i32) {
    %c0_i32 = arith.constant 0 : i32
    %c0_i32_0 = arith.constant 0 : i32
    return %arg0, %c0_i32 : i32, i32
  }
  func.func @transform_1(%arg0: i32) -> (i32, i32) {
    %c0_i32 = arith.constant 0 : i32
    %c0_i32_0 = arith.constant 0 : i32
    %c0_i32_1 = arith.constant 0 : i32
    return %c0_i32, %c0_i32_0 : i32, i32
  }
  func.func @transform_2(%arg0: i32) -> (i32, i32) {
    %c0_i32 = arith.constant 0 : i32
    %c0_i32_0 = arith.constant 0 : i32
    %c0_i32_1 = arith.constant 0 : i32
    return %c0_i32, %c0_i32_0 : i32, i32
  }
  func.func @transform_3(%arg0: i32) -> (i32, i32) {
    %c0_i32 = arith.constant 0 : i32
    %c0_i32_0 = arith.constant 0 : i32
    %c0_i32_1 = arith.constant 0 : i32
    return %c0_i32, %c0_i32_0 : i32, i32
  }
  func.func @transform_4(%arg0: i32) -> (i32, i32) {
    %c0_i32 = arith.constant 0 : i32
    %c0_i32_0 = arith.constant 0 : i32
    %c0_i32_1 = arith.constant 0 : i32
    return %c0_i32, %c0_i32_0 : i32, i32
  }
  func.func @transform_5(%arg0: i32) -> (i32, i32) {
    %c0_i32 = arith.constant 0 : i32
    %c0_i32_0 = arith.constant 0 : i32
    return %arg0, %c0_i32 : i32, i32
  }
}

</mosaic_0001>

<bundles_post_ra>
// kernel: tpu_custom_call.1
= control target key start
LH: loop header
LB: loop body
LE: loop exit
PB: predicated region body
PF: predicated region fallthrough
CT: control target
= control target key end

     0   :  { %v342_v1 = vmov 0.0   ;;  %vm343_vm0 = vmmov 0   ;;  %vm52_vm1 = vcmask 261120   ;;  %s422_s0 = inlined_call_operand.vmem [shape: bf16[16,32], index: 0, kind: input, shape index: {}]   ;;  %s423_s1 = inlined_call_operand.vmem [shape: bf16[32,128], index: 1, kind: input, shape index: {}]   ;;  %s424_s2 = inlined_call_operand.vmem [shape: f32[1,128], index: 2, kind: input, shape index: {}]   ;;  %s425_s3 = inlined_call_operand.vmem [shape: bf16[128,32], index: 3, kind: input, shape index: {}]   ;;  %s426_s4 = inlined_call_operand.vmem [shape: f32[1,32], index: 4, kind: input, shape index: {}]   ;;  %s427_s5 = inlined_call_operand.hbm [shape: f32[16,32], index: 5, kind: output, shape index: {}]  }
   0x1   :  { %v305_v0 = vld [vmem:[%s423_s1 + $0x8] sm:$0xff]   ;;  %272 = vmatprep.subr.bf16.mxu0 %v342_v1  ;;  %280 = vmatprep.subr.bf16.mxu1 %v342_v1  ;;  %v306_v2 = vld [vmem:[%s423_s1] sm:$0xff]  }
   0x2   :  { %273 = vmatpush3.bf16.msra.mxu0 %v305_v0  ;;  %276 = vmatprep.mubr.msk.bf16.mxu0 %vm343_vm0, %v342_v1  ;;  %v307_v3 = vld [vmem:[%s422_s0] sm:$0xff]  }
   0x3   :  { %274 = vmatprep.subr.bf16.mxu0 %v342_v1  ;;  %296 = vmatprep.mubr.msk.bf16.mxu1 %vm343_vm0, %v342_v1 }
   0x6   :  { %275 = vmatpush3.bf16.msra.mxu0 %v306_v2 }
   0x7   :  { %10 = vsyncpa [#allocation3], 0  ;;  %v308_v4 = vld [vmem:[%s425_s3 + $0x38] sm:$0xff]   ;;  %v309_v5 = vld [vmem:[%s425_s3 + $0x30] sm:$0xff]   ;;  %s344_s15 = smov [#allocation2]  }
   0x8   :  { %281 = vmatpush3.bf16.msra.mxu1 %v308_v4  ;;  %v310_v6 = vld [vmem:[%s425_s3 + $0x28] sm:$0xff]   ;;  %v311_v7 = vld [vmem:[%s425_s3 + $0x20] sm:$0xff]   ;;  %v312_v8 = vld [vmem:[%s425_s3 + $0x18] sm:$0xff]   ;;  %s235_s16 = sshll.u32 %s344_s15, 4  ;;  %s236_s16 = int_to_ptr.vmem [resolvable:$true] %s235_s16 }
   0x9   :  { %277 = vmatmul.mubr.msk.bf16.vlgmr.msra.gmra.mxu0 %vm52_vm1, %v307_v3  ;;  %282 = vmatprep.subr.bf16.mxu1 %v342_v1  ;;  %v313_v9 = vld [vmem:[%s425_s3 + $0x10] sm:$0xff]   ;;  %v314_v10 = vld [vmem:[%s425_s3 + $0x8] sm:$0xff]   ;;  %v315_v11 = vld [vmem:[%s425_s3] sm:$0xff]   ;;  %s320_s17 = scalar_lea.vmem %s236_s16, 256  ;;  %p325_p1 = scmp.lt.s32.totalorder %s236_s16, %s236_s16 }
   0xa   :  { %v246_v12 = vld [vmem:[%s424_s2] ss:$0 sm:$0xff]  ;;  %p321_p0 = scmp.ne.s32.totalorder %s236_s16, %s320_s17  ;;  %p326_p2 = scmp.lt.s32.totalorder %s320_s17, %s320_s17 }
   0xb   :  { %v251_v38 = vld [vmem:[%s426_s4] ss:$0 sm:$0xff] }
   0xc   :  { %283 = vmatpush3.bf16.msra.mxu1 %v309_v5  ;;  %p327_p3 = por %p326_p2, %p325_p1 }
   0xd   :  { %284 = vmatprep.subr.bf16.mxu1 %v342_v1 }
   0xe   :  { %p328_p4 = pnand %p327_p3, %p321_p0 }
  0x10   :  { %285 = vmatpush3.bf16.msra.mxu1 %v310_v6 }
  0x11   :  { %286 = vmatprep.subr.bf16.mxu1 %v342_v1 }
  0x14   :  { %287 = vmatpush3.bf16.msra.mxu1 %v311_v7 }
  0x15   :  { %288 = vmatprep.subr.bf16.mxu1 %v342_v1 }
  0x18   :  { %289 = vmatpush3.bf16.msra.mxu1 %v312_v8 }
  0x19   :  { %290 = vmatprep.subr.bf16.mxu1 %v342_v1 }
  0x1c   :  { %291 = vmatpush3.bf16.msra.mxu1 %v313_v9 }
  0x1d   :  { %292 = vmatprep.subr.bf16.mxu1 %v342_v1 }
  0x20   :  { %293 = vmatpush3.bf16.msra.mxu1 %v314_v10 }
  0x21   :  { %294 = vmatprep.subr.bf16.mxu1 %v342_v1 }
  0x24   :  { %295 = vmatpush3.bf16.msra.mxu1 %v315_v11 }
  0xc9   :  { %v90_v13 = vpop.f32.mrf.mxu0 }
  0xca   :  { %v91_v14 = vadd.f32 %v246_v12, %v90_v13 }
  0xcb   :  { %v278_v15 = vpop.f32.mrf.mxu0 }
  0xcc   :  { %v99_v16 = vmul.f32 0.044715, %v91_v14  ;;  %v97_v32 = vmul.f32 0.5, %v91_v14 }
  0xcd   :  { %v93_v17 = vpop.f32.mrf.mxu0 }
  0xce   :  { %v101_v18 = vmul.f32 %v99_v16, %v91_v14  ;;  %v94_v19 = vadd.f32 %v246_v12, %v93_v17 }
  0xcf   :  { %v279_v20 = vpop.f32.mrf.mxu0 }
  0xd0   :  { %v103_v21 = vmul.f32 %v101_v18, %v91_v14  ;;  %v100_v22 = vmul.f32 0.044715, %v94_v19  ;;  %v98_v33 = vmul.f32 0.5, %v94_v19 }
  0xd2   :  { %v102_v23 = vmul.f32 %v100_v22, %v94_v19  ;;  %v105_v24 = vadd.f32 %v103_v21, %v91_v14 }
  0xd4   :  { %v104_v25 = vmul.f32 %v102_v23, %v94_v19  ;;  %v107_v26 = vmul.f32 0.7978846, %v105_v24 }
  0xd6   :  { %v106_v27 = vadd.f32 %v104_v25, %v94_v19  ;;  %316 = vtanh.f32 %v107_v26 }
  0xd8   :  { %v108_v28 = vmul.f32 0.7978846, %v106_v27 }
  0xda   :  { %318 = vtanh.f32 %v108_v28 }
  0xe3   :  { %v317_v29 = vpop.eup %316 }
  0xe4   :  { %v111_v30 = vadd.f32 1.0, %v317_v29 }
  0xe6   :  { %v113_v35 = vmul.f32 %v111_v30, %v97_v32 }
  0xe7   :  { %v319_v31 = vpop.eup %318 }
  0xe8   :  { %v112_v34 = vadd.f32 1.0, %v319_v31 }
  0xea   :  { %v114_v36 = vmul.f32 %v112_v34, %v98_v33 }
  0xec   :  { %v115_v37 = vpack.c.bf16 %v114_v36, %v113_v35 }
  0xee   :  { %297 = vmatmul.mubr.bf16.vlgmr.msra.gmra.mxu1 %v115_v37 }
 0x1ae   :  { %v221_v39 = vpop.f32.mrf.mxu1 }
 0x1af   :  { %v222_v40 = vadd.f32 %v251_v38, %v221_v39 }
 0x1b0   :  { %v298_v41 = vpop.f32.mrf.mxu1 }
 0x1b1   :  { %228 = vst.msk [vmem:[#allocation2] sm:$0xff] %vm52_vm1, %v222_v40 }
 0x1b2   :  { %v224_v42 = vpop.f32.mrf.mxu1 }
 0x1b3   :  { %v225_v43 = vadd.f32 %v251_v38, %v224_v42 }
 0x1b4   :  { %v299_v44 = vpop.f32.mrf.mxu1 }
 0x1b5   :  { %229 = vst.msk [vmem:[#allocation2 + $0x8] sm:$0xff] %vm52_vm1, %v225_v43 }
 0x1b6   :  { %331 = shalt.err (!%p328_p4)
}
 0x1b7   :  { %s345_s4 = smov 128   ;;  %s346_s18 = smov 8  }
 0x1b8   :  { %241 = dma.vmem_to_hbm [thread:$0]  %s236_s16, 256, %s427_s5, [#allocation3], %s345_s4, %s345_s4, %s346_s18  }
 0x1b9   :  { %340 = dma.done.wait [#allocation3], 256  }
 0x1ba   :  { %341 = vsyncadd [#allocation3], 4294967040 }
 0x1bb   :  { %245 = vsyncpa [#allocation3], 1 }

</bundles_post_ra>
